<compile_context>
chip_gen: v7x
topology: tpu7x:2x2x1
jax: 0.10.0
libtpu: 0.0.40
codegen_flags: <defaults>
</compile_context>

<pallas_src>
import functools

import jax
import jax.numpy as jnp
from jax import lax
from jax.experimental import pallas as pl
from jax.experimental.pallas import tpu as pltpu


def _round_up(x, m):
    return (x + m - 1) // m * m


def _conv1d_kernel(x_hbm, w_ref, b_ref, o_ref, x_buf, sem, *,
                   k, stride, dilation, tl, tl_in, c_in, c_out, mxu_dtype):
    # x_hbm : (N, C_in, L_pad)      raw HBM ref (manual DMA)
    # w_ref : (K, C_out, C_in)      per-tap weight panels, resident in VMEM
    # b_ref : (C_out, 1)            bias
    # o_ref : (1, C_out, TL)        output tile
    # x_buf : (2, C_in, TL_in)      double-buffered halo windows (VMEM scratch)
    # sem   : DMA semaphores (2,)
    b = pl.program_id(0)
    j = pl.program_id(1)
    n_j = pl.num_programs(1)

    def issue(tile_idx, slot):
        start = tile_idx * (tl * stride)
        pltpu.make_async_copy(
            x_hbm.at[b, :, pl.ds(start, tl_in)],
            x_buf.at[slot],
            sem.at[slot],
        ).start()

    cur = j & 1

    # First tile of this batch element: blocking fetch into slot 0.
    @pl.when(j == 0)
    def _():
        issue(0, 0)

    # Prefetch the next tile's halo window into the other slot.
    @pl.when(j + 1 < n_j)
    def _():
        issue(j + 1, (j + 1) & 1)

    # Wait for the current tile's window.
    pltpu.make_async_copy(
        x_hbm.at[b, :, pl.ds(0, tl_in)], x_buf.at[cur], sem.at[cur]
    ).wait()

    # Per-tap matmul on the MXU, f32 accumulation.
    acc = jnp.zeros((c_out, tl), jnp.float32)
    if stride == 1:
        for t in range(k):
            # Offset window read straight from the VMEM ref (no strided copy).
            x_t = x_buf[cur, :, pl.ds(t * dilation, tl)]
            w_t = w_ref[t]
            acc = acc + jnp.dot(w_t.astype(mxu_dtype), x_t.astype(mxu_dtype),
                                preferred_element_type=jnp.float32)
    else:
        # Generic strided path: load the (small) tile window once, slice per tap.
        xw = x_buf[cur]
        for t in range(k):
            x_t = lax.slice(
                xw, (0, t * dilation),
                (c_in, t * dilation + stride * (tl - 1) + 1),
                (1, stride))
            w_t = w_ref[t]
            acc = acc + jnp.dot(w_t.astype(mxu_dtype), x_t.astype(mxu_dtype),
                                preferred_element_type=jnp.float32)

    acc = acc + b_ref[...].astype(jnp.float32)   # (C_out, 1) broadcast over L
    o_ref[0] = acc.astype(o_ref.dtype)


def conv_norm(x, weight, bias, *, stride=1, padding=None, dilation=1):
    """ConvNorm forward (conv-only path).

    x: (N, C_in, L); weight: (C_out, C_in, K) (torch Conv1d layout); bias: (C_out,).
    """
    n, c_in, length = x.shape
    c_out, c_in_w, k = weight.shape
    assert c_in_w == c_in
    if padding is None:
        assert k % 2 == 1
        padding = dilation * (k - 1) // 2

    l_out = (length + 2 * padding - dilation * (k - 1) - 1) // stride + 1
    assert l_out > 0

    # Output L tile: lane-aligned multiple of 128 (256 when it pays off for the
    # 256-wide MXUs on v6e/v7x), kept modest for v7x's 64 MiB VMEM.
    tl = min(256, _round_up(l_out, 128))
    n_j = pl.cdiv(l_out, tl)
    l_out_pad = n_j * tl

    # Halo-inclusive input window per output tile, rounded to full lanes.
    tl_in = _round_up((tl - 1) * stride + dilation * (k - 1) + 1, 128)

    # Pad on the host so every DMA window is in-bounds.  (Left pad = conv
    # padding; extra right zeros only feed discarded padded output positions.)
    needed = (n_j - 1) * tl * stride + tl_in
    right_pad = max(0, needed - padding - length)
    x_pad = jnp.pad(x, ((0, 0), (0, 0), (padding, right_pad)))

    # (C_out, C_in, K) -> (K, C_out, C_in): each tap is an MXU-ready panel.
    w_taps = jnp.transpose(weight, (2, 0, 1))
    b2d = bias.reshape(c_out, 1)

    # Feed the MXU bf16 when the model dtype is bf16; accumulate in f32 always.
    mxu_dtype = jnp.bfloat16 if x.dtype == jnp.bfloat16 else jnp.float32

    kernel = functools.partial(
        _conv1d_kernel, k=k, stride=stride, dilation=dilation,
        tl=tl, tl_in=tl_in, c_in=c_in, c_out=c_out, mxu_dtype=mxu_dtype)

    itemsize = x.dtype.itemsize
    vmem_est = (2 * c_in * tl_in * itemsize          # halo double buffer
                + 2 * c_out * tl * itemsize          # pipelined output blocks
                + k * c_out * max(c_in, 128) * itemsize   # resident weights
                + c_out * 128 * 4)                   # bias (padded)
    vmem_limit = int(min(96 * 2**20, max(32 * 2**20, 4 * vmem_est)))

    out = pl.pallas_call(
        kernel,
        out_shape=jax.ShapeDtypeStruct((n, c_out, l_out_pad), x.dtype),
        grid_spec=pltpu.PrefetchScalarGridSpec(
            num_scalar_prefetch=0,
            grid=(n, n_j),
            in_specs=[
                pl.BlockSpec(memory_space=pl.ANY),                   # x in HBM
                pl.BlockSpec((k, c_out, c_in), lambda b, j: (0, 0, 0)),
                pl.BlockSpec((c_out, 1), lambda b, j: (0, 0)),
            ],
            out_specs=pl.BlockSpec((1, c_out, tl), lambda b, j: (b, 0, j)),
            scratch_shapes=[
                pltpu.VMEM((2, c_in, tl_in), x.dtype),
                pltpu.SemaphoreType.DMA((2,)),
            ],
        ),
        compiler_params=pltpu.CompilerParams(
            dimension_semantics=("parallel", "arbitrary"),
            vmem_limit_bytes=vmem_limit,
        ),
    )(x_pad, w_taps, b2d)

    return out[:, :, :l_out]


def _reference(x, weight, bias, *, stride, padding, dilation):
    dn = ("NCH", "OIH", "NCH")
    out = lax.conv_general_dilated(
        x, weight, window_strides=(stride,), padding=[(padding, padding)],
        rhs_dilation=(dilation,), dimension_numbers=dn,
        precision=lax.Precision.HIGHEST)
    return out + bias[None, :, None]


if __name__ == "__main__":
    # Small shapes consistent with the module's forward.
    batch, in_channels, out_channels = 2, 4, 8
    length = 16

    key = jax.random.PRNGKey(0)
    kx, kw, kb = jax.random.split(key, 3)
    x = jax.random.normal(kx, (batch, in_channels, length), dtype=jnp.float32)

    configs = [
        dict(kernel_size=3, stride=1, dilation=1),   # ConvNorm default-style
        dict(kernel_size=5, stride=2, dilation=2),   # exercises strided path
    ]
    for cfg in configs:
        ks, st, dl = cfg["kernel_size"], cfg["stride"], cfg["dilation"]
        pad = dl * (ks - 1) // 2                      # ConvNorm's default padding
        w = jax.random.normal(kw, (out_channels, in_channels, ks), jnp.float32) * 0.3
        b = jax.random.normal(kb, (out_channels,), jnp.float32) * 0.1

        out = conv_norm(x, w, b, stride=st, padding=pad, dilation=dl)
        out = jax.block_until_ready(out)

        ref = _reference(x, w, b, stride=st, padding=pad, dilation=dl)
        assert out.shape == ref.shape, (out.shape, ref.shape)
        assert jnp.allclose(out, ref, atol=1e-4, rtol=1e-4), (
            float(jnp.max(jnp.abs(out - ref))))

    print("KERNEL_OK")
</pallas_src>

<mosaic_0001>
module attributes {stable_mosaic.version = 11 : i64} {
  func.func @_conv1d_kernel(%arg0: i32, %arg1: i32, %arg2: memref<2x4x256xf32, #tpu.memory_space<any>>, %arg3: memref<3x8x4xf32, #tpu.memory_space<vmem>>, %arg4: memref<8x1xf32, #tpu.memory_space<vmem>>, %arg5: memref<1x8x128xf32, #tpu.memory_space<vmem>>, %arg6: memref<2x4x256xf32, #tpu.memory_space<vmem>>, %arg7: memref<2x!tpu.dma_semaphore, #tpu.memory_space<semaphore_mem>>) attributes {dimension_semantics = [#tpu.dimension_semantics<parallel>, #tpu.dimension_semantics<arbitrary>], iteration_bounds = array<i64: 2, 1>, scalar_prefetch = 0 : i64, scratch_operands = 2 : i64, tpu.core_type = #tpu.core_type<tc>, window_params = [{}, {pipeline_mode = #tpu.pipeline_mode<synchronous>, transform_indices = @transform_1, window_bounds = array<i64: 3, 8, 4>}, {pipeline_mode = #tpu.pipeline_mode<synchronous>, transform_indices = @transform_2, window_bounds = array<i64: 8, 1>}, {transform_indices = @transform_3, window_bounds = array<i64: 1, 8, 128>}]} {
    %c1_i32 = arith.constant 1 : i32
    %0 = arith.andi %arg1, %c1_i32 : i32
    %c0_i32 = arith.constant 0 : i32
    %1 = arith.cmpi eq, %arg1, %c0_i32 : i32
    %2 = arith.extui %1 : i1 to i32
    %c0_i32_0 = arith.constant 0 : i32
    %3 = arith.cmpi ne, %2, %c0_i32_0 : i32
    scf.if %3 {
      %c0_i32_28 = arith.constant 0 : i32
      %c0_i32_29 = arith.constant 0 : i32
      %c0_i32_30 = arith.constant 0 : i32
      %c0_i32_31 = arith.constant 0 : i32
      %42 = tpu.memref_slice %arg2[%arg0, %c0_i32_30, %c0_i32_31] : memref<2x4x256xf32, #tpu.memory_space<any>> -> memref<1x4x256xf32, #tpu.memory_space<any>>
      %43 = tpu.memref_squeeze %42 : memref<1x4x256xf32, #tpu.memory_space<any>> -> memref<4x256xf32, #tpu.memory_space<any>>
      %c0_i32_32 = arith.constant 0 : i32
      %c0_i32_33 = arith.constant 0 : i32
      %44 = tpu.memref_slice %arg6[%c0_i32_28, %c0_i32_32, %c0_i32_33] : memref<2x4x256xf32, #tpu.memory_space<vmem>> -> memref<1x4x256xf32, #tpu.memory_space<vmem>>
      %45 = tpu.memref_squeeze %44 : memref<1x4x256xf32, #tpu.memory_space<vmem>> -> memref<4x256xf32, #tpu.memory_space<vmem>>
      %46 = tpu.memref_slice %arg7[%c0_i32_29] : memref<2x!tpu.dma_semaphore, #tpu.memory_space<semaphore_mem>> -> memref<1x!tpu.dma_semaphore, #tpu.memory_space<semaphore_mem>>
      %47 = tpu.memref_squeeze %46 : memref<1x!tpu.dma_semaphore, #tpu.memory_space<semaphore_mem>> -> memref<!tpu.dma_semaphore, #tpu.memory_space<semaphore_mem>>
      tpu.enqueue_dma source(%43 : memref<4x256xf32, #tpu.memory_space<any>>) target(%45 : memref<4x256xf32, #tpu.memory_space<vmem>>) target_semaphore(%47 : memref<!tpu.dma_semaphore, #tpu.memory_space<semaphore_mem>>)
    } else {
    }
    %c1_i32_1 = arith.constant 1 : i32
    %4 = arith.addi %arg1, %c1_i32_1 : i32
    %c1_i32_2 = arith.constant 1 : i32
    %5 = arith.cmpi slt, %4, %c1_i32_2 : i32
    %6 = arith.extui %5 : i1 to i32
    %c0_i32_3 = arith.constant 0 : i32
    %7 = arith.cmpi ne, %6, %c0_i32_3 : i32
    scf.if %7 {
      %c1_i32_28 = arith.constant 1 : i32
      %42 = arith.addi %arg1, %c1_i32_28 : i32
      %c1_i32_29 = arith.constant 1 : i32
      %43 = arith.addi %arg1, %c1_i32_29 : i32
      %c1_i32_30 = arith.constant 1 : i32
      %44 = arith.andi %43, %c1_i32_30 : i32
      %c128_i32 = arith.constant 128 : i32
      %45 = arith.muli %42, %c128_i32 : i32
      %c0_i32_31 = arith.constant 0 : i32
      %46 = tpu.memref_slice %arg2[%arg0, %c0_i32_31, %45] : memref<2x4x256xf32, #tpu.memory_space<any>> -> memref<1x4x256xf32, #tpu.memory_space<any>>
      %47 = tpu.memref_squeeze %46 : memref<1x4x256xf32, #tpu.memory_space<any>> -> memref<4x256xf32, #tpu.memory_space<any>>
      %c0_i32_32 = arith.constant 0 : i32
      %c0_i32_33 = arith.constant 0 : i32
      %48 = tpu.memref_slice %arg6[%44, %c0_i32_32, %c0_i32_33] : memref<2x4x256xf32, #tpu.memory_space<vmem>> -> memref<1x4x256xf32, #tpu.memory_space<vmem>>
      %49 = tpu.memref_squeeze %48 : memref<1x4x256xf32, #tpu.memory_space<vmem>> -> memref<4x256xf32, #tpu.memory_space<vmem>>
      %50 = tpu.memref_slice %arg7[%44] : memref<2x!tpu.dma_semaphore, #tpu.memory_space<semaphore_mem>> -> memref<1x!tpu.dma_semaphore, #tpu.memory_space<semaphore_mem>>
      %51 = tpu.memref_squeeze %50 : memref<1x!tpu.dma_semaphore, #tpu.memory_space<semaphore_mem>> -> memref<!tpu.dma_semaphore, #tpu.memory_space<semaphore_mem>>
      tpu.enqueue_dma source(%47 : memref<4x256xf32, #tpu.memory_space<any>>) target(%49 : memref<4x256xf32, #tpu.memory_space<vmem>>) target_semaphore(%51 : memref<!tpu.dma_semaphore, #tpu.memory_space<semaphore_mem>>)
    } else {
    }
    %c0_i32_4 = arith.constant 0 : i32
    %c0_i32_5 = arith.constant 0 : i32
    %8 = tpu.memref_slice %arg2[%arg0, %c0_i32_4, %c0_i32_5] : memref<2x4x256xf32, #tpu.memory_space<any>> -> memref<1x4x256xf32, #tpu.memory_space<any>>
    %9 = tpu.memref_squeeze %8 : memref<1x4x256xf32, #tpu.memory_space<any>> -> memref<4x256xf32, #tpu.memory_space<any>>
    %c0_i32_6 = arith.constant 0 : i32
    %c0_i32_7 = arith.constant 0 : i32
    %10 = tpu.memref_slice %arg6[%0, %c0_i32_6, %c0_i32_7] : memref<2x4x256xf32, #tpu.memory_space<vmem>> -> memref<1x4x256xf32, #tpu.memory_space<vmem>>
    %11 = tpu.memref_squeeze %10 : memref<1x4x256xf32, #tpu.memory_space<vmem>> -> memref<4x256xf32, #tpu.memory_space<vmem>>
    %12 = tpu.memref_slice %arg7[%0] : memref<2x!tpu.dma_semaphore, #tpu.memory_space<semaphore_mem>> -> memref<1x!tpu.dma_semaphore, #tpu.memory_space<semaphore_mem>>
    %13 = tpu.memref_squeeze %12 : memref<1x!tpu.dma_semaphore, #tpu.memory_space<semaphore_mem>> -> memref<!tpu.dma_semaphore, #tpu.memory_space<semaphore_mem>>
    tpu.wait_dma2 semaphore(%13 : memref<!tpu.dma_semaphore, #tpu.memory_space<semaphore_mem>>) src(%9 : memref<4x256xf32, #tpu.memory_space<any>>) dst(%11 : memref<4x256xf32, #tpu.memory_space<vmem>>)
    %cst = arith.constant 0.000000e+00 : f32
    %14 = vector.broadcast %cst : f32 to vector<8x128xf32>
    %15 = arith.index_cast %0 : i32 to index
    %c0 = arith.constant 0 : index
    %c0_8 = arith.constant 0 : index
    %16 = vector.load %arg6[%15, %c0, %c0_8] : memref<2x4x256xf32, #tpu.memory_space<vmem>>, vector<1x4x128xf32>
    %17 = vector.shape_cast %16 : vector<1x4x128xf32> to vector<4x128xf32>
    %c0_9 = arith.constant 0 : index
    %c0_10 = arith.constant 0 : index
    %c0_11 = arith.constant 0 : index
    %18 = vector.load %arg3[%c0_9, %c0_10, %c0_11] : memref<3x8x4xf32, #tpu.memory_space<vmem>>, vector<1x8x4xf32>
    %19 = vector.shape_cast %18 : vector<1x8x4xf32> to vector<8x4xf32>
    %cst_12 = arith.constant dense<0.000000e+00> : vector<8x128xf32>
    %20 = tpu.matmul %19, %17, %cst_12 {dimension_numbers = #tpu.dot_dimension_numbers<[1], [0], [0], [1], [0, 0, 1, 1], [], []>} : vector<8x4xf32>, vector<4x128xf32>, vector<8x128xf32> -> vector<8x128xf32>
    %21 = arith.addf %14, %20 : vector<8x128xf32>
    %22 = arith.index_cast %0 : i32 to index
    %c0_13 = arith.constant 0 : index
    %c1 = arith.constant 1 : index
    %23 = vector.load %arg6[%22, %c0_13, %c1] : memref<2x4x256xf32, #tpu.memory_space<vmem>>, vector<1x4x128xf32>
    %24 = vector.shape_cast %23 : vector<1x4x128xf32> to vector<4x128xf32>
    %c1_14 = arith.constant 1 : index
    %c0_15 = arith.constant 0 : index
    %c0_16 = arith.constant 0 : index
    %25 = vector.load %arg3[%c1_14, %c0_15, %c0_16] : memref<3x8x4xf32, #tpu.memory_space<vmem>>, vector<1x8x4xf32>
    %26 = vector.shape_cast %25 : vector<1x8x4xf32> to vector<8x4xf32>
    %cst_17 = arith.constant dense<0.000000e+00> : vector<8x128xf32>
    %27 = tpu.matmul %26, %24, %cst_17 {dimension_numbers = #tpu.dot_dimension_numbers<[1], [0], [0], [1], [0, 0, 1, 1], [], []>} : vector<8x4xf32>, vector<4x128xf32>, vector<8x128xf32> -> vector<8x128xf32>
    %28 = arith.addf %21, %27 : vector<8x128xf32>
    %29 = arith.index_cast %0 : i32 to index
    %c0_18 = arith.constant 0 : index
    %c2 = arith.constant 2 : index
    %30 = vector.load %arg6[%29, %c0_18, %c2] : memref<2x4x256xf32, #tpu.memory_space<vmem>>, vector<1x4x128xf32>
    %31 = vector.shape_cast %30 : vector<1x4x128xf32> to vector<4x128xf32>
    %c2_19 = arith.constant 2 : index
    %c0_20 = arith.constant 0 : index
    %c0_21 = arith.constant 0 : index
    %32 = vector.load %arg3[%c2_19, %c0_20, %c0_21] : memref<3x8x4xf32, #tpu.memory_space<vmem>>, vector<1x8x4xf32>
    %33 = vector.shape_cast %32 : vector<1x8x4xf32> to vector<8x4xf32>
    %cst_22 = arith.constant dense<0.000000e+00> : vector<8x128xf32>
    %34 = tpu.matmul %33, %31, %cst_22 {dimension_numbers = #tpu.dot_dimension_numbers<[1], [0], [0], [1], [0, 0, 1, 1], [], []>} : vector<8x4xf32>, vector<4x128xf32>, vector<8x128xf32> -> vector<8x128xf32>
    %35 = arith.addf %28, %34 : vector<8x128xf32>
    %c0_23 = arith.constant 0 : index
    %c0_24 = arith.constant 0 : index
    %36 = vector.load %arg4[%c0_23, %c0_24] : memref<8x1xf32, #tpu.memory_space<vmem>>, vector<8x1xf32>
    %37 = vector.broadcast %36 : vector<8x1xf32> to vector<8x128xf32>
    %38 = arith.addf %35, %37 : vector<8x128xf32>
    %c0_25 = arith.constant 0 : index
    %c0_26 = arith.constant 0 : index
    %c0_27 = arith.constant 0 : index
    %39 = vector.load %arg5[%c0_25, %c0_26, %c0_27] : memref<1x8x128xf32, #tpu.memory_space<vmem>>, vector<1x8x128xf32>
    %40 = vector.shape_cast %39 : vector<1x8x128xf32> to vector<8x128xf32>
    %41 = vector.shape_cast %38 : vector<8x128xf32> to vector<1x8x128xf32>
    tpu.vector_store %arg5[%c0_25, %c0_26, %c0_27], %41 {strides = array<i32>} : memref<1x8x128xf32, #tpu.memory_space<vmem>>, vector<1x8x128xf32>,
    return
  }
  func.func @transform_1(%arg0: i32, %arg1: i32) -> (i32, i32, i32) {
    %c0_i32 = arith.constant 0 : i32
    %c0_i32_0 = arith.constant 0 : i32
    %c0_i32_1 = arith.constant 0 : i32
    %c0_i32_2 = arith.constant 0 : i32
    return %c0_i32, %c0_i32_0, %c0_i32_1 : i32, i32, i32
  }
  func.func @transform_2(%arg0: i32, %arg1: i32) -> (i32, i32) {
    %c0_i32 = arith.constant 0 : i32
    %c0_i32_0 = arith.constant 0 : i32
    %c0_i32_1 = arith.constant 0 : i32
    return %c0_i32, %c0_i32_0 : i32, i32
  }
  func.func @transform_3(%arg0: i32, %arg1: i32) -> (i32, i32, i32) {
    %c0_i32 = arith.constant 0 : i32
    %c0_i32_0 = arith.constant 0 : i32
    return %arg0, %c0_i32, %arg1 : i32, i32, i32
  }
}

</mosaic_0001>

<bundles_post_ra>
// kernel: tpu_custom_call.1
= control target key start
LH: loop header
LB: loop body
LE: loop exit
PB: predicated region body
PF: predicated region fallthrough
CT: control target
= control target key end

     0   :  { %8 = vsyncpa [#allocation5], 0  ;;  %s989_s0 = inlined_call_operand.vmem [shape: f32[2,4,256], index: 0, kind: input, shape index: {}]   ;;  %s990_s1 = inlined_call_operand.vmem [shape: f32[3,8,4], index: 1, kind: input, shape index: {}]   ;;  %s991_s2 = inlined_call_operand.vmem [shape: f32[8,1], index: 2, kind: input, shape index: {}]   ;;  %s992_s3 = inlined_call_operand.hbm [shape: f32[2,8,128], index: 3, kind: output, shape index: {}]  }
   0x1   :  { %10 = vsyncpa [#allocation5 + $0x1], 0  ;;  %s846_s12 = smov 0   ;;  %s848_s13 = smov 0  }
   0x2   :  { %s850_s14 = smov 0   ;;  %s852_s15 = smov 0  }
   0x3   :  { %s854_s16 = smov 0   ;;  %s856_s17 = smov 0  }
   0x4 LB: > { %s627_s18 = sadd.s32 4294967295, %s818_s17   ;;  %s628_s19 = sadd.s32 4294967294, %s818_s17   ;;  %s818_s17 = sphi %s856_s17, %s16_s17   ;;  %s814_s16 = sphi %s854_s16, %s999_s16   ;;  %s810_s15 = sphi %s852_s15, %s998_s15   ;;  %s806_s14 = sphi %s850_s14, %s997_s14   ;;  %s802_s13 = sphi %s848_s13, %s996_s13   ;;  %s798_s12 = sphi %s846_s12, %s995_s12  }
   0x5   : > { %s28_s20 = sadd.s32 1, %s814_s16  ;;  %s79_s21 = sadd.s32 1, %s806_s14 }
   0x6   : > { %p30_p0 = scmp.ge.s32.totalorder %s28_s20, 2  ;;  %p89_p1 = scmp.ne.s32.totalorder %s806_s14, %s802_s13 }
   0x7   : > { %p90_p2 = scmp.eq.s32.totalorder %s627_s18, 1  ;;  %p95_p3 = scmp.ne.s32.totalorder %s802_s13, %s798_s12 }
   0x8   : > { %s1001_s20 = smov (%p30_p0, %s28_s20), 0  ;;  %p96_p5 = scmp.eq.s32.totalorder %s628_s19, 1 }
   0x9   : > { %p886_p4 = por %p90_p2, %p89_p1  ;;  %s74_s23 = ssub.s32 %s814_s16, %s1001_s20 }
   0xa   : > { %p630_p6 = scmp.ge.s32.totalorder %s818_s17, 1  ;;  %p77_p7 = scmp.eq.s32.totalorder %s74_s23, 0 }
   0xb   : > { %p893_p8 = por %p96_p5, %p95_p3  ;;  %p120_p9 = scmp.lt.s32.totalorder %s818_s17, 3 }
   0xc   : > { %s899_s25 = scalar_select %p77_p7, %s806_s14, %s79_s21  }
   0xd   : > { %p121_p10 = pnand %p630_p6, %p120_p9 }
   0xe   : > { %s134_s26 = sand.u32 (!%p121_p10), 1, %s802_s13   ;;  %s652_s27 = sshll.u32 (!%p121_p10), %s810_s15, 3 }
   0xf   : > { %124 = sbr.rel (%p121_p10) target bundleno = 383 (0x17f), region = 28  ;;  %s905_s28 = sshll.u32 (!%p121_p10), %s134_s26, 3 }
  0x10   : > { %s144_s4 = scalar_lea.vmem (!%p121_p10), %s989_s0, %s652_s27  ;;  %s136_s5 = scalar_lea.vmem (!%p121_p10), [#allocation4], %s905_s28 }
  0x11   : > { %v177_v0 = vld [vmem:[%s144_s4] sm:$0xff] (!%p121_p10) }
  0x12   : > { %178 = vst [vmem:[#allocation2] sm:$0xff] (!%p121_p10), %v177_v0 }
  0x16   : > { %186 = vsyncadd [#allocation3], 128 }
  0x17   : > { %790 = dma.done.wait [#allocation3], 128 }
  0x18   : > { %791 = vsyncadd [#allocation3], 4294967168  ;;  %v820_v1 = vmov 0.0   ;;  %vm821_vm0 = vmmov 0   ;;  %vm271_vm1 = vcmask 1043456   ;;  %v822_v2 = vmov 0  }
  0x19   : > { %661 = vmatprep.subr.mxu0 %v820_v1  ;;  %666 = vmatprep.subr.mxu1 %v820_v1  ;;  %v420_v3 = vld [vmem:[#allocation2] sm:$0xff]  ;;  %vm267_vm2 = vcmask 31744   ;;  %s823_s6 = smov 126   ;;  %s824_s7 = smov 127   ;;  %vm265_vm3 = vcmask 1039360   ;;  %vm429_vm4 = vcmask 1031168  }
  0x1a   : > { %663 = vmatprep.mubr.msk.f32.mxu0 %vm821_vm0, %v820_v1  ;;  %668 = vmatprep.mubr.msk.f32.mxu1 %vm821_vm0, %v820_v1  ;;  %v254_v4 = vld [vmem:[#allocation2] sm:$0xf]  ;;  %v424_v5 = vcombine.high %v420_v3, %v420_v3  ;;  %v638_v12 = vld [vmem:[%s990_s1 + $0x8] sm:$0xff]  ;;  %v643_v15 = vld [vmem:[%s990_s1 + $0x10] sm:$0xff]  ;;  %s647_s27 = sshll.u32 %s810_s15, 7  ;;  %s530_s29 = sshll.u32 %s136_s5, 4  ;;  %s940_s29 = int_to_ptr.vmem [resolvable:$true] %s530_s29 }
  0x1b   : > { %736 = vset.pattern.permute.xlu0 %v822_v2  ;;  %425 = vrot.lane.b32.xlu1 %v420_v3, %s823_s6  ;;  %v255_v6 = vld [vmem:[%s990_s1] sm:$0xff]  ;;  %s738_s15 = scalar_lea.vmem %s940_s29, 128  ;;  %s825_s8 = smov [#allocation4]  }
  0x1c   : > { %261 = vrot.lane.b32.xlu0 %v420_v3, %s824_s7  ;;  %667 = vmatpush3.msk.msra.mxu1 %vm271_vm1, %v254_v4  ;;  %v507_v7 = vld [vmem:[%s991_s2] sm:$0xff]  ;;  %p739_p11 = scmp.ne.s32.totalorder %s940_s29, %s738_s15  ;;  %s742_s9 = sshll.u32 %s825_s8, 4  ;;  %s743_s9 = int_to_ptr.vmem [resolvable:$false] %s742_s9 }
  0x1d   : > { %669 = vmatmul.mubr.msk.f32.vlgmr.msra.gmra.mrb[0].mxu1 %vm267_vm2, %v255_v6  ;;  %s744_s10 = scalar_lea.vmem %s743_s9, 256  ;;  %p745_p0 = scmp.lt.s32.totalorder %s940_s29, %s743_s9 }
  0x1e   : > { %p740_p12 = pnand %p739_p11, %p886_p4  ;;  %p746_p1 = scmp.lt.s32.totalorder %s744_s10, %s738_s15 }
  0x1f   : > { %427 = vrot.lane.b32.xlu1 %v424_v5, %s823_s6  ;;  %s938_s6 = scalar_lea.hbm %s992_s3, %s647_s27 }
  0x20   : > { %263 = vrot.lane.b32.xlu0 %v424_v5, %s824_s7  ;;  %s516_s7 = scalar_lea.sflag [#allocation5], %s134_s26  ;;  %p741_p13 = pneg %p740_p12 }
  0x21   : > { %p747_p2 = por %p746_p1, %p745_p0 }
  0x23   : > { %p748_p3 = pnand %p747_p2, %p741_p13 }
  0x24   : > { %510 = vperm.xlu0 %736, %v507_v7  }
  0x8d   : > { %v426_v8 = vpop.permute.xlu1 %425 }
  0x8e   : > { %v262_v9 = vpop.permute.xlu0 %261 }
  0x91   : > { %v428_v10 = vpop.permute.xlu1 %427 }
  0x92   : > { %v264_v11 = vpop.permute.xlu0 %263  ;;  %v430_v14 = vsel %vm429_vm4, %v426_v8, %v428_v10 }
  0x93   : > { %v266_v13 = vsel %vm265_vm3, %v262_v9, %v264_v11 }
  0x94   : > { %662 = vmatpush3.msk.msra.mxu0 %vm271_vm1, %v266_v13 }
  0x95   : > { %664 = vmatmul.mubr.msk.f32.vlgmr.msra.gmra.mrb[0].mxu0 %vm267_vm2, %v638_v12  ;;  %671 = vmatprep.subr.mxu0 %v820_v1 }
  0x96   : > { %672 = vmatpush3.msk.msra.mxu0 %vm271_vm1, %v430_v14  ;;  %673 = vmatprep.mubr.msk.f32.mxu0 %vm821_vm0, %v820_v1 }
  0x99   : > { %674 = vmatmul.mubr.msk.f32.vlgmr.msra.gmra.mrb[2].mxu0 %vm267_vm2, %v643_v15 }
  0xa3   : > { %v511_v22 = vpop.permute.xlu0 %510 }
  0xf0   : > { %v416_v16 = vpop.f32.mrb[0].mxu1 }
  0xf1   : > { %v670_v17 = vpop.f32.mrb[1].mxu1 }
 0x168   : > { %v340_v18 = vpop.f32.mrb[0].mxu0 }
 0x169   : > { %v665_v19 = vpop.f32.mrb[1].mxu0  ;;  %v417_v20 = vadd.f32 %v416_v16, %v340_v18 }
 0x16c   : > { %v502_v21 = vpop.f32.mrb[2].mxu0 }
 0x16d   : > { %v506_v23 = vadd.f32 %v502_v21, %v417_v20  ;;  %v675_v24 = vpop.f32.mrb[3].mxu0 }
 0x16f   : > { %v513_v25 = vadd.f32 %v511_v22, %v506_v23 }
 0x171   : > { %514 = vst [vmem:[%s136_s5] sm:$0xff] %v513_v25 }
 0x172   : > { %751 = shalt.err (!%p748_p3)
}
 0x173   : > { %s752_s26 = scalar_lea.hbm %s938_s6, 128  ;;  %s756_s11 = scalar_lea.hbm %s992_s3, 256 }
 0x174   : > { %p753_p5 = scmp.ne.s32.totalorder %s938_s6, %s752_s26  ;;  %p757_p9 = scmp.lt.u32.totalorder %s938_s6, %s992_s3 }
 0x175   : > { %p758_p10 = scmp.lt.u32.totalorder %s756_s11, %s752_s26  ;;  %p760_p12 = scmp.lt.u32.totalorder %s752_s26, %s938_s6 }
 0x176   : > { %p754_p6 = pnand %p753_p5, %p886_p4 }
 0x177   : > { %p759_p11 = por %p758_p10, %p757_p9 }
 0x178   : > { %p755_p7 = pneg %p754_p6 }
 0x179   : > { %p761_p13 = por %p760_p12, %p759_p11 }
 0x17b   : > { %p762_p0 = pnand %p761_p13, %p755_p7 }
 0x17d   : > { %765 = shalt.err (!%p762_p0)
}
 0x17e   : > { %676 = dma.vmem_to_hbm [thread:$0]  (%p886_p4), %s940_s29, 128, %s938_s6, %s516_s7  }
 0x17f PF: > { %p682_p1 = scmp.ge.s32.totalorder %s818_s17, 2  ;;  %s542_s21 = sand.u32 1, %s798_s12  }
 0x180   : > { %s543_s23 = scalar_lea.sflag [#allocation5], %s542_s21 }
 0x181   : > { %p679_p2 = pnand %p682_p1, %p893_p8 }
 0x183   : > { %793 = dma.done.wait (!%p679_p2), %s543_s23, 128  }
 0x184   : > { %795 = vsyncadd (!%p679_p2), %s543_s23, 4294967168  ;;  %s16_s17 = sadd.s32 1, %s818_s17   ;;  %s995_s12 = smov %s802_s13 }
 0x185   : > { %p13_p3 = scmp.ge.s32.totalorder %s16_s17, 4   ;;  %s996_s13 = smov %s806_s14 }
 0x186   : > { %s997_s14 = smov %s899_s25  ;;  %s998_s15 = smov %s814_s16 }
 0x187   : > { %s999_s16 = smov %s1001_s20  ;;  %15 = sbr.rel (!%p13_p3) target bundleno = 4 (0x4), region = 161 }
 0x18e   :  { %548 = vsyncpa [#allocation5], 1 }
 0x18f   :  { %550 = vsyncpa [#allocation5 + $0x1], 1 }
 0x190   :  { %551 = vsyncmov [#allocation3] }
 0x193   :  { %s552_s22 = vpop.sfrf %551 }
 0x194   :  { %p650_p4 = scmp.ne.s32.totalorder %s552_s22, 0 }
 0x196   :  { %556 = shalt.err (%p650_p4)  }
 0x197   :  { %558 = vsyncmov [#allocation3 + $0x1] }
 0x19a   :  { %s559_s24 = vpop.sfrf %558 }
 0x19b   :  { %p651_p8 = scmp.ne.s32.totalorder %s559_s24, 0 }
 0x19d   :  { %563 = shalt.err (%p651_p8)  }

</bundles_post_ra>
